<compile_context>
chip_gen: v7x
topology: tpu7x:2x2x1
jax: 0.10.0
libtpu: 0.0.40
codegen_flags: <defaults>
</compile_context>

<pallas_src>
import functools

import jax
import jax.numpy as jnp
from jax.experimental import pallas as pl
from jax.experimental.pallas import tpu as pltpu


def _dice_kernel(logits_ref, labels_ref, inter_ref, s1_ref, s2_ref, *,
                 block_rows, rows_total, acc_rows, need_row_mask):
    """Grid step (n, rb): reduce one (TR, 128) tile of (virtual) sample n."""
    rb = pl.program_id(1)

    @pl.when(rb == 0)
    def _init():
        inter_ref[...] = jnp.zeros_like(inter_ref)
        s1_ref[...] = jnp.zeros_like(s1_ref)
        s2_ref[...] = jnp.zeros_like(s2_ref)

    # Upcast inside the kernel so callers can feed bf16 logits / int8 labels.
    m1 = jax.nn.sigmoid(logits_ref[0].astype(jnp.float32))   # (TR, 128)
    m2 = labels_ref[0].astype(jnp.float32)                    # (TR, 128)

    def _reduce_tile(x):
        if acc_rows == 8:
            # Layout-preserving reshape -> pure VALU vreg accumulation.
            return x.reshape(block_rows // 8, 8, 128).sum(axis=0)
        return jnp.sum(x, axis=0, keepdims=True)              # tiny-tile fallback

    def _accumulate(a, b):
        inter_ref[0] += _reduce_tile(a * b)
        s1_ref[0] += _reduce_tile(a)
        s2_ref[0] += _reduce_tile(b)

    if need_row_mask:
        last = pl.num_programs(1) - 1

        @pl.when(rb != last)
        def _full():
            _accumulate(m1, m2)

        @pl.when(rb == last)
        def _tail():
            # Only the final (partial) row block pays for masking.
            row = jax.lax.broadcasted_iota(jnp.int32, (block_rows, 128), 0)
            valid = row < (rows_total - rb * block_rows)       # scalar RHS
            _accumulate(jnp.where(valid, m1, 0.0), jnp.where(valid, m2, 0.0))
    else:
        _accumulate(m1, m2)


@functools.partial(jax.jit, static_argnames=("block_rows",))
def binary_dice_loss(logits, labels, block_rows=4096):
    """SoftDice loss, numerically matching PyTorch BinaryDiceLoss.forward.

    `logits` may be f32/bf16/f16 and `labels` f32/bf16/int8/uint8; both are
    upcast to f32 inside the kernel, so narrow producer dtypes cut HBM traffic.
    """
    num = labels.shape[0]
    logits2d = logits.reshape(num, -1)
    labels2d = labels.reshape(num, -1)
    d = logits2d.shape[1]

    # Lane-ragged feature count: pad logits with a large negative constant
    # (sigmoid -> 0) and labels with 0, so padded elements contribute nothing
    # and NO in-kernel masking is needed.  Only this edge-case path pays the
    # pad copy; the common UNet case (D % 128 == 0) is copy-free.
    d_pad = ((d + 127) // 128) * 128
    if d_pad != d:
        logits2d = jnp.pad(logits2d, ((0, 0), (0, d_pad - d)),
                           constant_values=-1e9)
        labels2d = jnp.pad(labels2d, ((0, 0), (0, d_pad - d)),
                           constant_values=0)
    r = d_pad // 128

    # Batch==1: split the sample's rows into two independent "virtual samples"
    # (free contiguous reshape) so both v7x TensorCores get work on the
    # "parallel" grid axis.  Partials are re-summed per real sample below.
    splits = 2 if (num == 1 and r % 2 == 0 and r >= 16) else 1
    vnum = num * splits
    rv = r // splits

    logits3d = logits2d.reshape(vnum, rv, 128)
    labels3d = labels2d.reshape(vnum, rv, 128)

    # Row-block size: full extent if it fits, otherwise a multiple of 8
    # (<= block_rows) to respect the (8,128) tiling rule.
    if rv <= block_rows or rv < 8:
        tr = rv
    else:
        tr = max(8, (min(block_rows, rv) // 8) * 8)
    num_rb = pl.cdiv(rv, tr)
    need_row_mask = (rv % tr) != 0
    acc_rows = 8 if tr % 8 == 0 else 1

    kernel = functools.partial(
        _dice_kernel, block_rows=tr, rows_total=rv,
        acc_rows=acc_rows, need_row_mask=need_row_mask)

    in_spec = pl.BlockSpec((1, tr, 128), lambda n, rb: (n, rb, 0))
    acc_spec = pl.BlockSpec((1, acc_rows, 128), lambda n, rb: (n, 0, 0))
    acc_shape = jax.ShapeDtypeStruct((vnum, acc_rows, 128), jnp.float32)

    inter, s1, s2 = pl.pallas_call(
        kernel,
        out_shape=(acc_shape, acc_shape, acc_shape),
        grid_spec=pltpu.PrefetchScalarGridSpec(
            num_scalar_prefetch=0,
            grid=(vnum, num_rb),
            in_specs=[in_spec, in_spec],
            out_specs=(acc_spec, acc_spec, acc_spec),
        ),
        compiler_params=pltpu.CompilerParams(
            dimension_semantics=("parallel", "arbitrary"),
            vmem_limit_bytes=32 * 1024 * 1024,
        ),
    )(logits3d, labels3d)

    # Tiny final reduction + score + mean in plain JAX.
    inter = inter.reshape(num, -1).sum(axis=1)
    s1 = s1.reshape(num, -1).sum(axis=1)
    s2 = s2.reshape(num, -1).sum(axis=1)
    eps = 1e-15
    score = 2.0 * (inter + eps) / (s1 + s2 + eps)
    return (1.0 - jnp.sum(score) / num).astype(jnp.float32)


def _reference(logits, labels):
    num = labels.shape[0]
    m1 = jax.nn.sigmoid(logits.astype(jnp.float32)).reshape(num, -1)
    m2 = labels.astype(jnp.float32).reshape(num, -1)
    inter = (m1 * m2).sum(1)
    score = 2.0 * (inter + 1e-15) / (m1.sum(1) + m2.sum(1) + 1e-15)
    return 1.0 - score.sum() / num


if __name__ == "__main__":
    key = jax.random.PRNGKey(0)
    keys = jax.random.split(key, 12)

    # 1) Main NCHW shape consistent with a UNet segmentation head.
    logits = jax.random.normal(keys[0], (2, 4, 16, 16), dtype=jnp.float32)
    labels = (jax.random.uniform(keys[1], (2, 4, 16, 16)) > 0.5).astype(jnp.float32)
    loss = binary_dice_loss(logits, labels)
    jax.block_until_ready(loss)
    ref = _reference(logits, labels)
    assert jnp.allclose(loss, ref, atol=1e-5, rtol=1e-5), (loss, ref)

    # 2) Ragged D (C*H*W not a multiple of 128) -> exercises the -1e9/0 pad path.
    logits_r = jax.random.normal(keys[2], (2, 3, 7, 9), dtype=jnp.float32)
    labels_r = (jax.random.uniform(keys[3], (2, 3, 7, 9)) > 0.5).astype(jnp.float32)
    loss_r = binary_dice_loss(logits_r, labels_r)
    jax.block_until_ready(loss_r)
    ref_r = _reference(logits_r, labels_r)
    assert jnp.allclose(loss_r, ref_r, atol=1e-5, rtol=1e-5), (loss_r, ref_r)

    # 3) Multi-block reduction (several row blocks per sample).
    logits_m = jax.random.normal(keys[4], (2, 4, 32, 32), dtype=jnp.float32)
    labels_m = (jax.random.uniform(keys[5], (2, 4, 32, 32)) > 0.5).astype(jnp.float32)
    loss_m = binary_dice_loss(logits_m, labels_m, block_rows=8)
    jax.block_until_ready(loss_m)
    ref_m = _reference(logits_m, labels_m)
    assert jnp.allclose(loss_m, ref_m, atol=1e-5, rtol=1e-5), (loss_m, ref_m)

    # 4) Row-ragged grid (r % TR != 0) -> exercises the pl.when-gated tail mask.
    logits_t = jax.random.normal(keys[6], (2, 3, 32, 32), dtype=jnp.float32)
    labels_t = (jax.random.uniform(keys[7], (2, 3, 32, 32)) > 0.5).astype(jnp.float32)
    loss_t = binary_dice_loss(logits_t, labels_t, block_rows=16)
    jax.block_until_ready(loss_t)
    ref_t = _reference(logits_t, labels_t)
    assert jnp.allclose(loss_t, ref_t, atol=1e-5, rtol=1e-5), (loss_t, ref_t)

    # 5) Narrow dtypes (bf16 logits, int8 labels) upcast inside the kernel.
    logits_n = jax.random.normal(keys[8], (2, 4, 16, 16), dtype=jnp.bfloat16)
    labels_n = (jax.random.uniform(keys[9], (2, 4, 16, 16)) > 0.5).astype(jnp.int8)
    loss_n = binary_dice_loss(logits_n, labels_n)
    jax.block_until_ready(loss_n)
    ref_n = _reference(logits_n, labels_n)
    assert jnp.allclose(loss_n, ref_n, atol=1e-4, rtol=1e-4), (loss_n, ref_n)

    # 6) Batch == 1 -> exercises the 2-way virtual-sample split (v7x dual-TC).
    logits_1 = jax.random.normal(keys[10], (1, 4, 32, 32), dtype=jnp.float32)
    labels_1 = (jax.random.uniform(keys[11], (1, 4, 32, 32)) > 0.5).astype(jnp.float32)
    loss_1 = binary_dice_loss(logits_1, labels_1)
    jax.block_until_ready(loss_1)
    ref_1 = _reference(logits_1, labels_1)
    assert jnp.allclose(loss_1, ref_1, atol=1e-5, rtol=1e-5), (loss_1, ref_1)

    print("KERNEL_OK")
</pallas_src>

<mosaic_0001>
module attributes {stable_mosaic.version = 11 : i64} {
  func.func @_dice_kernel(%arg0: i32, %arg1: i32, %arg2: memref<1x8x128xf32, #tpu.memory_space<vmem>>, %arg3: memref<1x8x128xf32, #tpu.memory_space<vmem>>, %arg4: memref<1x8x128xf32, #tpu.memory_space<vmem>>, %arg5: memref<1x8x128xf32, #tpu.memory_space<vmem>>, %arg6: memref<1x8x128xf32, #tpu.memory_space<vmem>>) attributes {dimension_semantics = [#tpu.dimension_semantics<parallel>, #tpu.dimension_semantics<arbitrary>], iteration_bounds = array<i64: 2, 1>, scalar_prefetch = 0 : i64, scratch_operands = 0 : i64, tpu.core_type = #tpu.core_type<tc>, window_params = [{transform_indices = @transform_0, window_bounds = array<i64: 1, 8, 128>}, {transform_indices = @transform_1, window_bounds = array<i64: 1, 8, 128>}, {transform_indices = @transform_2, window_bounds = array<i64: 1, 8, 128>}, {transform_indices = @transform_3, window_bounds = array<i64: 1, 8, 128>}, {transform_indices = @transform_4, window_bounds = array<i64: 1, 8, 128>}]} {
    %c0_i32 = arith.constant 0 : i32
    %0 = arith.cmpi eq, %arg1, %c0_i32 : i32
    %1 = arith.extui %0 : i1 to i32
    %c0_i32_0 = arith.constant 0 : i32
    %2 = arith.cmpi ne, %1, %c0_i32_0 : i32
    scf.if %2 {
      %cst_27 = arith.constant 0.000000e+00 : f32
      %37 = vector.broadcast %cst_27 : f32 to vector<1x8x128xf32>
      %c0_28 = arith.constant 0 : index
      %c0_29 = arith.constant 0 : index
      %c0_30 = arith.constant 0 : index
      %38 = vector.load %arg4[%c0_28, %c0_29, %c0_30] : memref<1x8x128xf32, #tpu.memory_space<vmem>>, vector<1x8x128xf32>
      tpu.vector_store %arg4[%c0_28, %c0_29, %c0_30], %37 {strides = array<i32>} : memref<1x8x128xf32, #tpu.memory_space<vmem>>, vector<1x8x128xf32>,
      %cst_31 = arith.constant 0.000000e+00 : f32
      %39 = vector.broadcast %cst_31 : f32 to vector<1x8x128xf32>
      %c0_32 = arith.constant 0 : index
      %c0_33 = arith.constant 0 : index
      %c0_34 = arith.constant 0 : index
      %40 = vector.load %arg5[%c0_32, %c0_33, %c0_34] : memref<1x8x128xf32, #tpu.memory_space<vmem>>, vector<1x8x128xf32>
      tpu.vector_store %arg5[%c0_32, %c0_33, %c0_34], %39 {strides = array<i32>} : memref<1x8x128xf32, #tpu.memory_space<vmem>>, vector<1x8x128xf32>,
      %cst_35 = arith.constant 0.000000e+00 : f32
      %41 = vector.broadcast %cst_35 : f32 to vector<1x8x128xf32>
      %c0_36 = arith.constant 0 : index
      %c0_37 = arith.constant 0 : index
      %c0_38 = arith.constant 0 : index
      %42 = vector.load %arg6[%c0_36, %c0_37, %c0_38] : memref<1x8x128xf32, #tpu.memory_space<vmem>>, vector<1x8x128xf32>
      tpu.vector_store %arg6[%c0_36, %c0_37, %c0_38], %41 {strides = array<i32>} : memref<1x8x128xf32, #tpu.memory_space<vmem>>, vector<1x8x128xf32>,
    } else {
    }
    %c0 = arith.constant 0 : index
    %c0_1 = arith.constant 0 : index
    %c0_2 = arith.constant 0 : index
    %3 = vector.load %arg2[%c0, %c0_1, %c0_2] : memref<1x8x128xf32, #tpu.memory_space<vmem>>, vector<1x8x128xf32>
    %4 = vector.shape_cast %3 : vector<1x8x128xf32> to vector<8x128xf32>
    %5 = arith.negf %4 : vector<8x128xf32>
    %6 = math.exp %5 : vector<8x128xf32>
    %cst = arith.constant 1.000000e+00 : f32
    %7 = vector.broadcast %cst : f32 to vector<8x128xf32>
    %8 = arith.addf %7, %6 : vector<8x128xf32>
    %9 = arith.divf %7, %8 : vector<8x128xf32>
    %c0_3 = arith.constant 0 : index
    %c0_4 = arith.constant 0 : index
    %c0_5 = arith.constant 0 : index
    %10 = vector.load %arg3[%c0_3, %c0_4, %c0_5] : memref<1x8x128xf32, #tpu.memory_space<vmem>>, vector<1x8x128xf32>
    %11 = vector.shape_cast %10 : vector<1x8x128xf32> to vector<8x128xf32>
    %c0_6 = arith.constant 0 : index
    %c0_7 = arith.constant 0 : index
    %c0_8 = arith.constant 0 : index
    %12 = vector.load %arg4[%c0_6, %c0_7, %c0_8] : memref<1x8x128xf32, #tpu.memory_space<vmem>>, vector<1x8x128xf32>
    %13 = vector.shape_cast %12 : vector<1x8x128xf32> to vector<8x128xf32>
    %14 = arith.mulf %9, %11 : vector<8x128xf32>
    %15 = vector.shape_cast %14 : vector<8x128xf32> to vector<1x8x128xf32>
    %cst_9 = arith.constant dense<0.000000e+00> : vector<8x128xf32>
    %16 = vector.multi_reduction <add>, %15, %cst_9 [0] : vector<1x8x128xf32> to vector<8x128xf32>
    %17 = arith.addf %13, %16 : vector<8x128xf32>
    %c0_10 = arith.constant 0 : index
    %c0_11 = arith.constant 0 : index
    %c0_12 = arith.constant 0 : index
    %18 = vector.load %arg4[%c0_10, %c0_11, %c0_12] : memref<1x8x128xf32, #tpu.memory_space<vmem>>, vector<1x8x128xf32>
    %19 = vector.shape_cast %18 : vector<1x8x128xf32> to vector<8x128xf32>
    %20 = vector.shape_cast %17 : vector<8x128xf32> to vector<1x8x128xf32>
    tpu.vector_store %arg4[%c0_10, %c0_11, %c0_12], %20 {strides = array<i32>} : memref<1x8x128xf32, #tpu.memory_space<vmem>>, vector<1x8x128xf32>,
    %c0_13 = arith.constant 0 : index
    %c0_14 = arith.constant 0 : index
    %c0_15 = arith.constant 0 : index
    %21 = vector.load %arg5[%c0_13, %c0_14, %c0_15] : memref<1x8x128xf32, #tpu.memory_space<vmem>>, vector<1x8x128xf32>
    %22 = vector.shape_cast %21 : vector<1x8x128xf32> to vector<8x128xf32>
    %23 = vector.shape_cast %9 : vector<8x128xf32> to vector<1x8x128xf32>
    %cst_16 = arith.constant dense<0.000000e+00> : vector<8x128xf32>
    %24 = vector.multi_reduction <add>, %23, %cst_16 [0] : vector<1x8x128xf32> to vector<8x128xf32>
    %25 = arith.addf %22, %24 : vector<8x128xf32>
    %c0_17 = arith.constant 0 : index
    %c0_18 = arith.constant 0 : index
    %c0_19 = arith.constant 0 : index
    %26 = vector.load %arg5[%c0_17, %c0_18, %c0_19] : memref<1x8x128xf32, #tpu.memory_space<vmem>>, vector<1x8x128xf32>
    %27 = vector.shape_cast %26 : vector<1x8x128xf32> to vector<8x128xf32>
    %28 = vector.shape_cast %25 : vector<8x128xf32> to vector<1x8x128xf32>
    tpu.vector_store %arg5[%c0_17, %c0_18, %c0_19], %28 {strides = array<i32>} : memref<1x8x128xf32, #tpu.memory_space<vmem>>, vector<1x8x128xf32>,
    %c0_20 = arith.constant 0 : index
    %c0_21 = arith.constant 0 : index
    %c0_22 = arith.constant 0 : index
    %29 = vector.load %arg6[%c0_20, %c0_21, %c0_22] : memref<1x8x128xf32, #tpu.memory_space<vmem>>, vector<1x8x128xf32>
    %30 = vector.shape_cast %29 : vector<1x8x128xf32> to vector<8x128xf32>
    %31 = vector.shape_cast %11 : vector<8x128xf32> to vector<1x8x128xf32>
    %cst_23 = arith.constant dense<0.000000e+00> : vector<8x128xf32>
    %32 = vector.multi_reduction <add>, %31, %cst_23 [0] : vector<1x8x128xf32> to vector<8x128xf32>
    %33 = arith.addf %30, %32 : vector<8x128xf32>
    %c0_24 = arith.constant 0 : index
    %c0_25 = arith.constant 0 : index
    %c0_26 = arith.constant 0 : index
    %34 = vector.load %arg6[%c0_24, %c0_25, %c0_26] : memref<1x8x128xf32, #tpu.memory_space<vmem>>, vector<1x8x128xf32>
    %35 = vector.shape_cast %34 : vector<1x8x128xf32> to vector<8x128xf32>
    %36 = vector.shape_cast %33 : vector<8x128xf32> to vector<1x8x128xf32>
    tpu.vector_store %arg6[%c0_24, %c0_25, %c0_26], %36 {strides = array<i32>} : memref<1x8x128xf32, #tpu.memory_space<vmem>>, vector<1x8x128xf32>,
    return
  }
  func.func @transform_0(%arg0: i32, %arg1: i32) -> (i32, i32, i32) {
    %c0_i32 = arith.constant 0 : i32
    %c0_i32_0 = arith.constant 0 : i32
    return %arg0, %arg1, %c0_i32 : i32, i32, i32
  }
  func.func @transform_1(%arg0: i32, %arg1: i32) -> (i32, i32, i32) {
    %c0_i32 = arith.constant 0 : i32
    %c0_i32_0 = arith.constant 0 : i32
    return %arg0, %arg1, %c0_i32 : i32, i32, i32
  }
  func.func @transform_2(%arg0: i32, %arg1: i32) -> (i32, i32, i32) {
    %c0_i32 = arith.constant 0 : i32
    %c0_i32_0 = arith.constant 0 : i32
    %c0_i32_1 = arith.constant 0 : i32
    return %arg0, %c0_i32, %c0_i32_0 : i32, i32, i32
  }
  func.func @transform_3(%arg0: i32, %arg1: i32) -> (i32, i32, i32) {
    %c0_i32 = arith.constant 0 : i32
    %c0_i32_0 = arith.constant 0 : i32
    %c0_i32_1 = arith.constant 0 : i32
    return %arg0, %c0_i32, %c0_i32_0 : i32, i32, i32
  }
  func.func @transform_4(%arg0: i32, %arg1: i32) -> (i32, i32, i32) {
    %c0_i32 = arith.constant 0 : i32
    %c0_i32_0 = arith.constant 0 : i32
    %c0_i32_1 = arith.constant 0 : i32
    return %arg0, %c0_i32, %c0_i32_0 : i32, i32, i32
  }
}

</mosaic_0001>

<bundles_post_ra>
// kernel: binary_dice_loss.1
= control target key start
LH: loop header
LB: loop body
LE: loop exit
PB: predicated region body
PF: predicated region fallthrough
CT: control target
= control target key end

     0   :  { %s525_s15 = smov 0   ;;  %s527_s16 = smov 0   ;;  %s564_s0 = inlined_call_operand.vmem [shape: f32[2,8,128], index: 0, kind: input, shape index: {}]   ;;  %s565_s1 = inlined_call_operand.vmem [shape: f32[2,8,128], index: 1, kind: input, shape index: {}]   ;;  %s566_s2 = inlined_call_operand.vmem [shape: f32[2,8,128], index: 2, kind: output, shape index: {0}]   ;;  %s567_s3 = inlined_call_operand.vmem [shape: f32[2,8,128], index: 3, kind: output, shape index: {1}]   ;;  %s568_s4 = inlined_call_operand.vmem [shape: f32[2,8,128], index: 4, kind: output, shape index: {2}]  }
   0x1   :  { %s529_s17 = smov 0  }
   0x2 LB: > { %s27_s18 = sadd.s32 1, %s494_s16  ;;  %p438_p0 = scmp.ge.s32.totalorder %s498_s17, 1  ;;  %s498_s17 = sphi %s529_s17, %s15_s17   ;;  %s494_s16 = sphi %s527_s16, %s570_s16   ;;  %s490_s15 = sphi %s525_s15, %s569_s15  }
   0x3   : > { %p29_p1 = scmp.ge.s32.totalorder %s27_s18, 2  ;;  %p197_p2 = scmp.lt.s32.totalorder %s498_s17, 3 }
   0x5   : > { %s572_s18 = smov (%p29_p1, %s27_s18), 0  ;;  %p198_p3 = pnand %p438_p0, %p197_p2 }
   0x6   : > { %p239_p4 = scmp.lt.s32.totalorder (!%p198_p3), %s490_s15, 1 }
   0x7   : > { %201 = sbr.rel (%p198_p3) target bundleno = 47 (0x2f), region = 28 }
   0xe   : > { %s574_s15 = smov (!%p239_p4, %s490_s15), 1 }
   0xf   : > { %s439_s19 = sshll.u32 %s574_s15, 3 }
  0x10   : > { %s245_s22 = scalar_lea.vmem %s564_s0, %s439_s19  ;;  %s252_s25 = scalar_lea.vmem %s565_s1, %s439_s19 }
  0x11   : > { %v272_v0 = vld [vmem:[%s245_s22] sm:$0xff]  ;;  %s264_s28 = scalar_lea.vmem %s568_s4, %s439_s19  ;;  %s260_s5 = scalar_lea.vmem %s567_s3, %s439_s19 }
  0x12   : > { %v444_v1 = vmul.f32 -1.442695, %v272_v0  ;;  %v279_v2 = vld [vmem:[%s252_s25] sm:$0xff]  ;;  %s256_s8 = scalar_lea.vmem %s566_s2, %s439_s19 }
  0x13   : > { %292 = vst [vmem:[%s264_s28] sm:$0xff] %v279_v2 }
  0x14   : > { %472 = vpow2.f32 %v444_v1 }
  0x1e   : > { %v473_v3 = vpop.eup %472 }
  0x1f   : > { %v276_v4 = vadd.f32 1.0, %v473_v3 }
  0x21   : > { %474 = vrcp.f32 %v276_v4 }
  0x2b   : > { %v475_v5 = vpop.eup %474 }
  0x2c   : > { %v281_v6 = vmul.f32 %v475_v5, %v279_v2  ;;  %288 = vst [vmem:[%s260_s5] sm:$0xff] %v475_v5 }
  0x2e   : > { %284 = vst [vmem:[%s256_s8] sm:$0xff] %v281_v6 }
  0x2f PF: > { %s15_s17 = sadd.s32 1, %s498_s17   ;;  %s569_s15 = smov %s494_s16 }
  0x30   : > { %p12_p5 = scmp.ge.s32.totalorder %s15_s17, 4   ;;  %s570_s16 = smov %s572_s18 }
  0x32   :  { %14 = sbr.rel (!%p12_p5) target bundleno = 2 (0x2), region = 89 }

</bundles_post_ra>
